<compile_context>
chip_gen: v7x
topology: tpu7x:2x2x1
jax: 0.10.0
libtpu: 0.0.40
codegen_flags: <defaults>
</compile_context>

<pallas_src>
import jax
import jax.numpy as jnp
from jax.experimental import pallas as pl
from jax.experimental.pallas import tpu as pltpu


def _normalize_kernel(x_ref, mean_ref, rstd_ref, out_ref):
    # x_ref/out_ref: (r_block, l_block) lane-dense tiles.
    # mean_ref/rstd_ref: (r_block, 1) f32 per-row constants (sublane broadcast).
    x = x_ref[...].astype(jnp.float32)
    out_ref[...] = ((x - mean_ref[...]) * rstd_ref[...]).astype(out_ref.dtype)


def _round_down(x, m):
    return (x // m) * m


def _tpu_config():
    """Return (target_block_bytes, vmem_capacity_bytes, num_tensorcores)."""
    vmem_cap = 128 * 1024 * 1024
    try:
        vmem_cap = int(pltpu.get_tpu_info().vmem_capacity_bytes)
    except Exception:
        pass
    if vmem_cap <= 96 * 1024 * 1024:
        # v7x-class: 64 MiB VMEM/TC, ~3.2 TB/s HBM, 2 TensorCores per chip.
        # Bigger tiles amortize the ~0.35 us per-grid-step overhead.
        return 8 * 1024 * 1024, vmem_cap, 2
    # v5e / v6e: 128 MiB VMEM, 1 TensorCore.
    return 4 * 1024 * 1024, vmem_cap, 1


# Caps lane-padding waste of the (r_block, 1) constant blocks
# (each occupies r_block * 128 * 4 bytes in VMEM).
_MAX_ROW_BLOCK = 2048


def normalization(img, mean, std, *, target_block_bytes=None):
    """(img - mean[:, None, None]) / std[:, None, None] for an NCHW image."""
    N, C, H, W = img.shape
    R, L = N * C, H * W
    itemsize = jnp.dtype(img.dtype).itemsize
    # Sublane packing: 8 rows/vreg for 32-bit, 16 for bf16, 32 for 8-bit dtypes.
    sublane = 8 * max(1, 4 // itemsize)

    auto_block, vmem_cap, num_cores = _tpu_config()
    if target_block_bytes is None:
        target_block_bytes = auto_block

    # Flatten to lane-dense 2D: one row per (n, c) spatial plane.
    x2d = img.reshape(R, L)

    # Per-row f32 constants:  out = (x - mean_row) * rstd_row.
    mean_f32 = jnp.asarray(mean, jnp.float32).reshape(C)
    std_f32 = jnp.asarray(std, jnp.float32).reshape(C)
    mean_row = jnp.tile(mean_f32, N).reshape(R, 1)
    rstd_row = jnp.tile(1.0 / std_f32, N).reshape(R, 1)

    # --- Tile selection ------------------------------------------------------
    target_elems = max(target_block_bytes // itemsize, 128 * sublane)

    # Lane (last-dim) block: prefer the full contiguous plane as long as even a
    # minimal (sublane, L) tile honours the byte budget (one long contiguous
    # HBM DMA per row group). Otherwise split lanes into a large multiple of
    # 128 sized so a (sublane, l_block) tile still fits the budget.
    if L <= 128 or L * sublane <= target_elems:
        l_block = L
    else:
        per_row = max(target_elems // sublane, 128)
        l_block = max(128, min(_round_down(per_row, 128), _round_down(L, 128)))

    # Row (second-to-last) block: as many rows as fit the budget, rounded to
    # sublane packing, capped so the per-row constant blocks stay small.
    if R <= sublane:
        r_block = R
    else:
        rows = max(target_elems // l_block, 1)
        r_block = max(sublane, min(_round_down(rows, sublane),
                                   _round_down(R, sublane)))
        r_block = min(r_block, _MAX_ROW_BLOCK)

    # Megacore (v7x): make sure the "parallel" grid has enough steps to shard
    # across TensorCores. Prefer splitting rows (keeps full-width contiguous
    # DMAs); only split lanes if rows alone cannot provide enough steps.
    if num_cores > 1:
        min_steps = 2 * num_cores

        def steps(rb, lb):
            return pl.cdiv(R, rb) * pl.cdiv(L, lb)

        while steps(r_block, l_block) < min_steps and r_block > sublane:
            r_block = max(sublane, _round_down(r_block // 2, sublane))
        while steps(r_block, l_block) < min_steps and l_block >= 256:
            new_l = max(128, _round_down(l_block // 2, 128))
            if new_l == l_block:
                break
            l_block = new_l

    grid = (pl.cdiv(R, r_block), pl.cdiv(L, l_block))

    # --- VMEM budget derived from the chosen blocks (double-buffered) --------
    io_tile = r_block * l_block * itemsize          # one input / output tile
    const_tile = r_block * 128 * 4                  # (r_block,1) f32 pads to 128 lanes
    vmem_needed = 2 * (2 * io_tile) + 2 * (2 * const_tile)
    vmem_limit = int(vmem_needed * 1.25) + (2 << 20)   # ~25% headroom
    vmem_limit = max(vmem_limit, 16 << 20)             # >= v5e scoped default
    vmem_limit = min(vmem_limit, vmem_cap)              # never beyond physical

    out2d = pl.pallas_call(
        _normalize_kernel,
        out_shape=jax.ShapeDtypeStruct((R, L), img.dtype),
        grid=grid,
        in_specs=[
            pl.BlockSpec((r_block, l_block), lambda i, j: (i, j)),
            # Lane axis j is the innermost grid dim, so these block indices are
            # unchanged across consecutive steps and their re-DMA is elided.
            pl.BlockSpec((r_block, 1), lambda i, j: (i, 0)),
            pl.BlockSpec((r_block, 1), lambda i, j: (i, 0)),
        ],
        out_specs=pl.BlockSpec((r_block, l_block), lambda i, j: (i, j)),
        compiler_params=pltpu.CompilerParams(
            dimension_semantics=("parallel", "parallel"),
            vmem_limit_bytes=int(vmem_limit),
        ),
    )(x2d, mean_row, rstd_row)

    return out2d.reshape(N, C, H, W)


if __name__ == "__main__":
    key = jax.random.PRNGKey(0)

    # --- Small shape matching the module spec (auto tile config) -------------
    N, C, H, W = 2, 4, 16, 16
    img = jax.random.uniform(key, (N, C, H, W), dtype=jnp.float32)
    mean = jnp.array([0.485, 0.456, 0.406, 0.5], dtype=jnp.float32)
    std = jnp.array([0.229, 0.224, 0.225, 0.25], dtype=jnp.float32)

    out = jax.block_until_ready(normalization(img, mean, std))
    ref = (img - mean[None, :, None, None]) / std[None, :, None, None]
    assert out.shape == (N, C, H, W)
    assert jnp.allclose(out, ref, atol=1e-6, rtol=1e-5)

    # --- Second check: tiny byte budget forces the lane-split path, a
    #     multi-step grid and masked edge tiles on both axes ------------------
    key2 = jax.random.PRNGKey(1)
    N2, C2, H2, W2 = 3, 4, 160, 160
    img2 = jax.random.uniform(key2, (N2, C2, H2, W2), dtype=jnp.float32)
    mean2 = jnp.array([0.485, 0.456, 0.406, 0.5], dtype=jnp.float32)
    std2 = jnp.array([0.229, 0.224, 0.225, 0.25], dtype=jnp.float32)

    out2 = jax.block_until_ready(
        normalization(img2, mean2, std2, target_block_bytes=64 * 1024))
    ref2 = (img2 - mean2[None, :, None, None]) / std2[None, :, None, None]
    assert out2.shape == (N2, C2, H2, W2)
    assert jnp.allclose(out2, ref2, atol=1e-6, rtol=1e-5)

    print("KERNEL_OK")
</pallas_src>

<mosaic_0001>
module attributes {stable_mosaic.version = 11 : i64} {
  func.func @_normalize_kernel(%arg0: i32, %arg1: i32, %arg2: memref<8x256xf32, #tpu.memory_space<vmem>>, %arg3: memref<8x1xf32, #tpu.memory_space<vmem>>, %arg4: memref<8x1xf32, #tpu.memory_space<vmem>>, %arg5: memref<8x256xf32, #tpu.memory_space<vmem>>) attributes {dimension_semantics = [#tpu.dimension_semantics<parallel>, #tpu.dimension_semantics<parallel>], iteration_bounds = array<i64: 1, 1>, scalar_prefetch = 0 : i64, scratch_operands = 0 : i64, tpu.core_type = #tpu.core_type<tc>, window_params = [{transform_indices = @transform_0, window_bounds = array<i64: 8, 256>}, {transform_indices = @transform_1, window_bounds = array<i64: 8, 1>}, {transform_indices = @transform_2, window_bounds = array<i64: 8, 1>}, {transform_indices = @transform_3, window_bounds = array<i64: 8, 256>}]} {
    %c0 = arith.constant 0 : index
    %c0_0 = arith.constant 0 : index
    %0 = vector.load %arg2[%c0, %c0_0] : memref<8x256xf32, #tpu.memory_space<vmem>>, vector<8x256xf32>
    %c0_1 = arith.constant 0 : index
    %c0_2 = arith.constant 0 : index
    %1 = vector.load %arg3[%c0_1, %c0_2] : memref<8x1xf32, #tpu.memory_space<vmem>>, vector<8x1xf32>
    %2 = vector.broadcast %1 : vector<8x1xf32> to vector<8x256xf32>
    %3 = arith.subf %0, %2 : vector<8x256xf32>
    %c0_3 = arith.constant 0 : index
    %c0_4 = arith.constant 0 : index
    %4 = vector.load %arg4[%c0_3, %c0_4] : memref<8x1xf32, #tpu.memory_space<vmem>>, vector<8x1xf32>
    %5 = vector.broadcast %4 : vector<8x1xf32> to vector<8x256xf32>
    %6 = arith.mulf %3, %5 : vector<8x256xf32>
    %c0_5 = arith.constant 0 : index
    %c0_6 = arith.constant 0 : index
    %7 = vector.load %arg5[%c0_5, %c0_6] : memref<8x256xf32, #tpu.memory_space<vmem>>, vector<8x256xf32>
    tpu.vector_store %arg5[%c0_5, %c0_6], %6 {strides = array<i32>} : memref<8x256xf32, #tpu.memory_space<vmem>>, vector<8x256xf32>,
    return
  }
  func.func @transform_0(%arg0: i32, %arg1: i32) -> (i32, i32) {
    %c0_i32 = arith.constant 0 : i32
    return %arg0, %arg1 : i32, i32
  }
  func.func @transform_1(%arg0: i32, %arg1: i32) -> (i32, i32) {
    %c0_i32 = arith.constant 0 : i32
    %c0_i32_0 = arith.constant 0 : i32
    return %arg0, %c0_i32 : i32, i32
  }
  func.func @transform_2(%arg0: i32, %arg1: i32) -> (i32, i32) {
    %c0_i32 = arith.constant 0 : i32
    %c0_i32_0 = arith.constant 0 : i32
    return %arg0, %c0_i32 : i32, i32
  }
  func.func @transform_3(%arg0: i32, %arg1: i32) -> (i32, i32) {
    %c0_i32 = arith.constant 0 : i32
    return %arg0, %arg1 : i32, i32
  }
}

</mosaic_0001>

<bundles_post_ra>
// kernel: tpu_custom_call.1
= control target key start
LH: loop header
LB: loop body
LE: loop exit
PB: predicated region body
PF: predicated region fallthrough
CT: control target
= control target key end

     0   :  { %s122_s0 = inlined_call_operand.vmem [shape: f32[8,256], index: 0, kind: input, shape index: {}]   ;;  %s123_s1 = inlined_call_operand.vmem [shape: f32[8,1], index: 1, kind: input, shape index: {}]   ;;  %s124_s2 = inlined_call_operand.vmem [shape: f32[8,1], index: 2, kind: input, shape index: {}]   ;;  %s125_s3 = inlined_call_operand.hbm [shape: f32[8,256], index: 3, kind: output, shape index: {}]  }
   0x1   :  { %v17_v0 = vld [vmem:[%s123_s1] sm:$0xff] }
   0x2   :  { %8 = vsyncpa [#allocation3], 0  ;;  %v76_v1 = vmov 0   ;;  %v25_v2 = vld [vmem:[%s124_s2] sm:$0xff]  ;;  %v16_v5 = vld [vmem:[%s122_s0 + $0x8] sm:$0xff]  ;;  %s77_s20 = smov [#allocation2]  }
   0x3   :  { %51 = vset.pattern.permute.xlu0 %v76_v1  ;;  %v15_v4 = vld [vmem:[%s122_s0] sm:$0xff]  ;;  %s41_s1 = sshll.u32 %s77_s20, 4  ;;  %s42_s1 = int_to_ptr.vmem [resolvable:$true] %s41_s1 }
   0x4   :  { %20 = vperm.xlu0 %51, %v17_v0   ;;  %s52_s2 = scalar_lea.vmem %s42_s1, 256  ;;  %p57_p1 = scmp.lt.s32.totalorder %s42_s1, %s42_s1 }
   0x5   :  { %p53_p0 = scmp.ne.s32.totalorder %s42_s1, %s52_s2  ;;  %p58_p2 = scmp.lt.s32.totalorder %s52_s2, %s52_s2 }
   0x7   :  { %p59_p3 = por %p58_p2, %p57_p1 }
   0x8   :  { %28 = vperm.xlu0 %51, %v25_v2  }
   0x9   :  { %p60_p4 = pnand %p59_p3, %p53_p0 }
  0x83   :  { %v21_v3 = vpop.permute.xlu0 %20 }
  0x84   :  { %v23_v6 = vsub.f32 %v15_v4, %v21_v3  ;;  %v24_v7 = vsub.f32 %v16_v5, %v21_v3 }
  0x87   :  { %v29_v8 = vpop.permute.xlu0 %28 }
  0x88   :  { %v31_v9 = vmul.f32 %v29_v8, %v23_v6  ;;  %v32_v10 = vmul.f32 %v29_v8, %v24_v7 }
  0x8a   :  { %33 = vst [vmem:[#allocation2] sm:$0xff] %v31_v9  ;;  %34 = vst [vmem:[#allocation2 + $0x8] sm:$0xff] %v32_v10 }
  0x8b   :  { %63 = shalt.err (!%p60_p4)
}
  0x8c   :  { %s64_s0 = scalar_lea.hbm %s125_s3, 256 }
  0x8d   :  { %p65_p5 = scmp.ne.s32.totalorder %s125_s3, %s64_s0  ;;  %p68_p6 = scmp.lt.u32.totalorder %s64_s0, %s125_s3 }
  0x8f   :  { %p70_p7 = pnand %p68_p6, %p65_p5 }
  0x91   :  { %73 = shalt.err (!%p70_p7)
}
  0x92   :  { %44 = dma.vmem_to_hbm [thread:$0]  %s42_s1, 256, %s125_s3, [#allocation3]  }
  0x93   :  { %74 = dma.done.wait [#allocation3], 256  }
  0x94   :  { %75 = vsyncadd [#allocation3], 4294967040 }
  0x95   :  { %48 = vsyncpa [#allocation3], 1 }

</bundles_post_ra>
